<compile_context>
chip_gen: v7x
topology: tpu7x:2x2x1
jax: 0.10.0
libtpu: 0.0.40
codegen_flags: <defaults>
</compile_context>

<pallas_src>
import jax
import jax.numpy as jnp
from jax.experimental import pallas as pl
from jax.experimental.pallas import tpu as pltpu


def _logreg_kernel(params_ref, x_ref, o_ref):
    # params_ref: SMEM (3,) f32 = [w0, w1, b]
    # x_ref:      VMEM (2, TILE) f32   (features on sublanes, batch on lanes)
    # o_ref:      VMEM (1, TILE) f32   (lane-dense output tile)
    w0 = params_ref[0]
    w1 = params_ref[1]
    b = params_ref[2]

    x = x_ref[...]                                   # (2, TILE)
    z = w0 * x[0:1, :] + w1 * x[1:2, :] + b          # (1, TILE), pure VPU
    # exp on EUP; the single divide per vreg is negligible and keeps exact f32.
    o_ref[...] = (1.0 / (1.0 + jnp.exp(-z))).astype(o_ref.dtype)


def logistic_regression(x, weight, bias, *, tile=1024):
    """Pallas equivalent of torch.sigmoid(nn.Linear(2,1)(x)).squeeze(-1).

    x:      (N, 2) float32
    weight: (1, 2) float32   (PyTorch Linear weight layout: (out, in))
    bias:   (1,)   float32
    returns (N,)   float32
    """
    n, f = x.shape
    assert f == 2, "LogisticRegression expects 2 input features"

    # Pad batch to a tile multiple and present it lane-dense as (2, N_pad).
    n_pad = ((n + tile - 1) // tile) * tile
    xt = jnp.zeros((f, n_pad), jnp.float32).at[:, :n].set(
        x.astype(jnp.float32).T
    )

    # Scalar parameters live in SMEM: [w0, w1, b].
    params = jnp.concatenate(
        [weight.reshape(-1).astype(jnp.float32),
         bias.reshape(-1).astype(jnp.float32)]
    )

    grid = (n_pad // tile,)
    out = pl.pallas_call(
        _logreg_kernel,
        out_shape=jax.ShapeDtypeStruct((1, n_pad), jnp.float32),
        grid=grid,
        in_specs=[
            # 3 scalars -> SMEM, passed whole every grid step.
            pl.BlockSpec(memory_space=pltpu.MemorySpace.SMEM),
            # (2, tile): first dim equals full array dim, last dim % 128 == 0.
            pl.BlockSpec((f, tile), lambda i: (0, i)),
        ],
        out_specs=pl.BlockSpec((1, tile), lambda i: (0, i)),
        compiler_params=pltpu.CompilerParams(
            dimension_semantics=("parallel",),
        ),
    )(params, xt)

    return out[0, :n]                                # drop padding, squeeze(-1)


if __name__ == "__main__":
    key = jax.random.PRNGKey(0)
    kx, kw, kb = jax.random.split(key, 3)

    N, F_IN, F_OUT = 8, 2, 1
    x = jax.random.normal(kx, (N, F_IN), dtype=jnp.float32)

    # Deterministic "Linear(2, 1)" parameters (same uniform range PyTorch uses:
    # U(-1/sqrt(in_features), 1/sqrt(in_features))).
    bound = 1.0 / jnp.sqrt(jnp.float32(F_IN))
    weight = jax.random.uniform(kw, (F_OUT, F_IN), jnp.float32, -bound, bound)
    bias = jax.random.uniform(kb, (F_OUT,), jnp.float32, -bound, bound)

    y = logistic_regression(x, weight, bias)
    jax.block_until_ready(y)

    # Reference check in plain JAX.
    y_ref = jax.nn.sigmoid(x @ weight.T + bias)[:, 0]
    assert y.shape == (N,)
    assert jnp.allclose(y, y_ref, atol=1e-6, rtol=1e-6)

    print("KERNEL_OK")
</pallas_src>

<mosaic_0001>
module attributes {stable_mosaic.version = 11 : i64} {
  func.func @_logreg_kernel(%arg0: i32, %arg1: memref<3xf32, #tpu.memory_space<smem>>, %arg2: memref<2x1024xf32, #tpu.memory_space<vmem>>, %arg3: memref<1x1024xf32, #tpu.memory_space<vmem>>) attributes {dimension_semantics = [#tpu.dimension_semantics<parallel>], iteration_bounds = array<i64: 1>, scalar_prefetch = 0 : i64, scratch_operands = 0 : i64, tpu.core_type = #tpu.core_type<tc>, window_params = [{transform_indices = @transform_0, window_bounds = array<i64: 3>}, {transform_indices = @transform_1, window_bounds = array<i64: 2, 1024>}, {transform_indices = @transform_2, window_bounds = array<i64: 1, 1024>}]} {
    %c0 = arith.constant 0 : index
    %0 = memref.load %arg1[%c0] : memref<3xf32, #tpu.memory_space<smem>>
    %c1 = arith.constant 1 : index
    %1 = memref.load %arg1[%c1] : memref<3xf32, #tpu.memory_space<smem>>
    %c2 = arith.constant 2 : index
    %2 = memref.load %arg1[%c2] : memref<3xf32, #tpu.memory_space<smem>>
    %c0_0 = arith.constant 0 : index
    %c0_1 = arith.constant 0 : index
    %3 = vector.load %arg2[%c0_0, %c0_1] : memref<2x1024xf32, #tpu.memory_space<vmem>>, vector<2x1024xf32>
    %4 = vector.extract_strided_slice %3 {offsets = [0, 0], sizes = [1, 1024], strides = [1, 1]} : vector<2x1024xf32> to vector<1x1024xf32>
    %5 = vector.broadcast %0 : f32 to vector<1x1024xf32>
    %6 = arith.mulf %5, %4 : vector<1x1024xf32>
    %7 = vector.extract_strided_slice %3 {offsets = [1, 0], sizes = [1, 1024], strides = [1, 1]} : vector<2x1024xf32> to vector<1x1024xf32>
    %8 = vector.broadcast %1 : f32 to vector<1x1024xf32>
    %9 = arith.mulf %8, %7 : vector<1x1024xf32>
    %10 = arith.addf %6, %9 : vector<1x1024xf32>
    %11 = vector.broadcast %2 : f32 to vector<1x1024xf32>
    %12 = arith.addf %10, %11 : vector<1x1024xf32>
    %cst = arith.constant 0.000000e+00 : f32
    %13 = vector.broadcast %cst : f32 to vector<1x1024xf32>
    %14 = arith.subf %13, %12 : vector<1x1024xf32>
    %15 = math.exp %14 : vector<1x1024xf32>
    %cst_2 = arith.constant 1.000000e+00 : f32
    %16 = vector.broadcast %cst_2 : f32 to vector<1x1024xf32>
    %17 = arith.addf %16, %15 : vector<1x1024xf32>
    %cst_3 = arith.constant 1.000000e+00 : f32
    %18 = vector.broadcast %cst_3 : f32 to vector<1x1024xf32>
    %19 = arith.divf %18, %17 : vector<1x1024xf32>
    %c0_4 = arith.constant 0 : index
    %c0_5 = arith.constant 0 : index
    %20 = vector.load %arg3[%c0_4, %c0_5] : memref<1x1024xf32, #tpu.memory_space<vmem>>, vector<1x1024xf32>
    tpu.vector_store %arg3[%c0_4, %c0_5], %19 {strides = array<i32>} : memref<1x1024xf32, #tpu.memory_space<vmem>>, vector<1x1024xf32>,
    return
  }
  func.func @transform_0(%arg0: i32) -> i32 {
    %c0_i32 = arith.constant 0 : i32
    %c0_i32_0 = arith.constant 0 : i32
    return %c0_i32 : i32
  }
  func.func @transform_1(%arg0: i32) -> (i32, i32) {
    %c0_i32 = arith.constant 0 : i32
    %c0_i32_0 = arith.constant 0 : i32
    return %c0_i32, %arg0 : i32, i32
  }
  func.func @transform_2(%arg0: i32) -> (i32, i32) {
    %c0_i32 = arith.constant 0 : i32
    %c0_i32_0 = arith.constant 0 : i32
    return %c0_i32, %arg0 : i32, i32
  }
}

</mosaic_0001>

<bundles_post_ra>
// kernel: tpu_custom_call.1
= control target key start
LH: loop header
LB: loop body
LE: loop exit
PB: predicated region body
PF: predicated region fallthrough
CT: control target
= control target key end

     0   :  { %7 = vsyncpa [#allocation5], 0  ;;  %s237_s0 = inlined_call_operand.hbm [shape: f32[3], index: 0, kind: input, shape index: {}]   ;;  %s238_s1 = inlined_call_operand.hbm [shape: f32[2,1024], index: 1, kind: input, shape index: {}]   ;;  %s239_s2 = inlined_call_operand.hbm [shape: f32[1,1024], index: 2, kind: output, shape index: {}]  }
   0x1   :  { %8 = vsyncpa [#allocation3], 0 }
   0x2   :  { %9 = vsyncpa [#allocation4], 0  ;;  %s122_s11 = scalar_lea.hbm %s237_s0, 16 }
   0x3   :  { %p123_p0 = scmp.ne.s32.totalorder %s237_s0, %s122_s11  ;;  %p126_p1 = scmp.lt.u32.totalorder %s122_s11, %s237_s0 }
   0x5   :  { %p128_p2 = pnand %p126_p1, %p123_p0 }
   0x7   :  { %131 = shalt.err (!%p128_p2)
}
   0x8   :  { %s182_s16 = smov [#allocation2]   ;;  %s183_s19 = smov [#allocation6]  }
   0x9   :  { %17 = dma.hbm_to_smem %s237_s0, 16, %s182_s16, [#allocation5]  }
   0xa   :  { %s24_s20 = sshll.u32 %s183_s19, 4  ;;  %s132_s23 = scalar_lea.hbm %s238_s1, 256  ;;  %s25_s20 = int_to_ptr.vmem [resolvable:$true] %s24_s20 }
   0xb   :  { %p133_p3 = scmp.ne.s32.totalorder %s238_s1, %s132_s23  ;;  %p136_p4 = scmp.lt.u32.totalorder %s132_s23, %s238_s1 }
   0xd   :  { %p138_p5 = pnand %p136_p4, %p133_p3 }
   0xf   :  { %141 = shalt.err (!%p138_p5)
}
  0x10   :  { %s142_s28 = scalar_lea.vmem %s25_s20, 256  ;;  %p147_p7 = scmp.lt.s32.totalorder %s25_s20, %s25_s20 }
  0x11   :  { %p143_p6 = scmp.ne.s32.totalorder %s25_s20, %s142_s28  ;;  %p148_p8 = scmp.lt.s32.totalorder %s142_s28, %s142_s28 }
  0x13   :  { %p149_p9 = por %p148_p8, %p147_p7 }
  0x15   :  { %p150_p10 = pnand %p149_p9, %p143_p6 }
  0x17   :  { %153 = shalt.err (!%p150_p10)
}
  0x18   :  { %27 = dma.hbm_to_vmem [thread:$0]  %s238_s1, 256, %s25_s20, [#allocation3]  }
  0x19   :  { %176 = dma.done.wait [#allocation5], 16  }
  0x1a   :  { %177 = vsyncadd [#allocation5], 4294967280 }
  0x1b   :  { %178 = dma.done.wait [#allocation3], 256  }
  0x1c   :  { %179 = vsyncadd [#allocation3], 4294967040 }
  0x1d   :  { %34 = sfence }
  0x1e   :  { %s35_s30 = sld [smem:[#allocation2]]  ;;  %s106_s3 = sld [smem:[#allocation2 + $0x1]]  ;;  %v38_v0 = vld [vmem:[#allocation6] sm:$0xff]  ;;  %v39_v1 = vld [vmem:[#allocation6 + $0x8] sm:$0xff]  ;;  %v184_v23 = vmov 1966171168   ;;  %v76_v25 = vlaneseq }
  0x1f   :  { %s107_s4 = sld [smem:[#allocation2 + $0x2]]  ;;  %v74_v24 = vunpack.c.l.s4 %v184_v23  ;;  %s185_s1 = smov [#allocation7]  }
  0x20   :  { %v77_v27 = vshrl.u32 %v76_v25, 7  ;;  %s96_s5 = sshll.u32 %s185_s1, 4  ;;  %s97_s5 = int_to_ptr.vmem [resolvable:$true] %s96_s5 }
  0x21   :  { %v75_v26 = vunpack.c.0.s8 %v74_v24  ;;  %s154_s6 = scalar_lea.vmem %s97_s5, 128  ;;  %p159_p12 = scmp.lt.s32.totalorder %s97_s5, %s97_s5 }
  0x22   :  { %p155_p11 = scmp.ne.s32.totalorder %s97_s5, %s154_s6  ;;  %p160_p13 = scmp.lt.s32.totalorder %s154_s6, %s154_s6 }
  0x23   :  { %v78_v28 = vsub.s32 %v75_v26, %v77_v27 }
  0x24   :  { %v40_v2 = vstv %s35_s30  ;;  %v43_v3 = vstv %s106_s3  ;;  %p161_p0 = por %p160_p13, %p159_p12 }
  0x25   :  { %v41_v4 = vmul.f32 %v40_v2, %v38_v0  ;;  %v42_v5 = vmul.f32 %v40_v2, %v39_v1  ;;  %v44_v6 = vmul.f32 %v43_v3, %v38_v0  ;;  %v45_v7 = vmul.f32 %v43_v3, %v39_v1 }
  0x26   :  { %v56_v10 = vstv %s107_s4  ;;  %p162_p1 = pnand %p161_p0, %p155_p11 }
  0x27   :  { %v108_v8 = vrot.slane %v44_v6, 9  ;;  %v109_v9 = vrot.slane %v45_v7, 9 }
  0x29   :  { %v54_v11 = vadd.f32 %v108_v8, %v41_v4  ;;  %v55_v12 = vadd.f32 %v109_v9, %v42_v5 }
  0x2b   :  { %v57_v13 = vadd.f32 %v56_v10, %v54_v11  ;;  %v58_v14 = vadd.f32 %v56_v10, %v55_v12 }
  0x2d   :  { %v59_v15 = vsub.f32 0.0, %v57_v13  ;;  %v60_v16 = vsub.f32 0.0, %v58_v14 }
  0x2f   :  { %v61_v17 = vmul.f32 1.442695, %v59_v15  ;;  %v63_v18 = vmul.f32 1.442695, %v60_v16 }
  0x31   :  { %114 = vpow2.f32 %v61_v17 }
  0x32   :  { %116 = vpow2.f32 %v63_v18 }
  0x3b   :  { %v115_v19 = vpop.eup %114 }
  0x3c   :  { %v117_v20 = vpop.eup %116  ;;  %v65_v21 = vadd.f32 1.0, %v115_v19 }
  0x3d   :  { %v66_v22 = vadd.f32 1.0, %v117_v20 }
  0x3e   :  { %118 = vrcp.f32 %v65_v21 }
  0x3f   :  { %120 = vrcp.f32 %v66_v22 }
  0x48   :  { %v119_v29 = vpop.eup %118 }
  0x49   :  { %v121_v30 = vpop.eup %120  ;;  %v79_v31 = vrot.slane %v119_v29, %v78_v28 }
  0x4a   :  { %v86_v32 = vrot.slane %v121_v30, %v78_v28 }
  0x4c   :  { %v87_v33 = vcombine.low %v79_v31, %v86_v32 }
  0x4e   :  { %89 = vst [vmem:[#allocation7] sm:$0xff] %v87_v33 }
  0x4f   :  { %165 = shalt.err (!%p162_p1)
}
  0x50   :  { %s166_s9 = scalar_lea.hbm %s239_s2, 128 }
  0x51   :  { %p167_p2 = scmp.ne.s32.totalorder %s239_s2, %s166_s9  ;;  %p170_p3 = scmp.lt.u32.totalorder %s166_s9, %s239_s2 }
  0x53   :  { %p172_p4 = pnand %p170_p3, %p167_p2 }
  0x55   :  { %175 = shalt.err (!%p172_p4)
}
  0x56   :  { %99 = dma.vmem_to_hbm [thread:$0]  %s97_s5, 128, %s239_s2, [#allocation4]  }
  0x57   :  { %180 = dma.done.wait [#allocation4], 128  }
  0x58   :  { %181 = vsyncadd [#allocation4], 4294967168 }
  0x59   :  { %103 = vsyncpa [#allocation3], 1 }
  0x5a   :  { %104 = vsyncpa [#allocation4], 1 }
  0x5b   :  { %105 = vsyncpa [#allocation5], 1 }

</bundles_post_ra>
